<compile_context>
chip_gen: v6e
topology: v6e:2x2x1
jax: 0.10.0
libtpu: 0.0.40
codegen_flags: <defaults>
</compile_context>

<pallas_src>
import functools

import jax
import jax.numpy as jnp
from jax.experimental import pallas as pl
from jax.experimental.pallas import tpu as pltpu

MAXDISP = 192

_SUBLANES = 8
_MAX_ROW_TILE = 2048
_INPUT_BYTES_PER_STEP = 6 * 1024 * 1024    # all input tiles, one pipeline stage
_VMEM_LIMIT = 48 * 1024 * 1024             # <= v7x's 64 MiB physical VMEM


def _cdiv(a, b):
    return -(-a // b)


def _round_up(a, b):
    return _cdiv(a, b) * b


@functools.lru_cache(maxsize=1)
def _num_tc_splits():
    """2 on v7x (2 TensorCores/chip), 1 on single-TC chips (v5e / v6e)."""
    try:
        kind = jax.devices()[0].device_kind.lower()
    except Exception:  # pragma: no cover - defensive
        return 1
    return 2 if ("v7" in kind or "7x" in kind) else 1


def _choose_lane_width(gt):
    """Lane width for the zero-copy 2-D view of the flattened inputs."""
    n = gt.size
    for c in (512, 256, 128):          # lane-dense widths (multiples of 128)
        if n % c == 0:
            return c
    return gt.shape[-1]                # natural width (full-dim block is legal)


def _plan_rows(rows, lanes, num_inputs, n_splits):
    """Pick (row_tile, steps): bounded VMEM, <8 rows of padding per split."""
    lanes_padded = _round_up(lanes, 128)
    bytes_per_row = num_inputs * lanes_padded * 4
    rt_max = (_INPUT_BYTES_PER_STEP // max(1, bytes_per_row)) \
        // _SUBLANES * _SUBLANES
    rt_max = max(_SUBLANES, min(_MAX_ROW_TILE, rt_max))
    if rows < _SUBLANES:
        return rows, 1                 # tiny input: one full-dim row block
    rt_max = min(rt_max, rows // _SUBLANES * _SUBLANES)
    steps = _cdiv(rows, n_splits * rt_max)
    row_tile = _round_up(_cdiv(rows, n_splits * steps), _SUBLANES)
    return row_tile, steps


def _kd_sums_kernel(*refs, maxdisp, num_preds, valid_rows, compute_d1,
                    mask_rows):
    """Accumulates [count, sl1_sum_0..P-1, (err_sum_0..P-1 if compute_d1)]."""
    gt_ref = refs[0]
    pred_refs = refs[1:1 + num_preds]
    out_ref = refs[1 + num_preds]

    @pl.when(pl.program_id(1) == 0)
    def _init():
        out_ref[...] = jnp.zeros_like(out_ref)

    gt = gt_ref[...].astype(jnp.float32)          # (row_tile, lanes)
    row_tile, lanes = gt.shape

    mask = (gt > 0.0) & (gt < maxdisp)
    if mask_rows:
        # Last block(s) extend past the real rows: gate them out.  Using
        # selects (not multiplies) below keeps garbage NaN/Inf from leaking.
        block = pl.program_id(0) * pl.num_programs(1) + pl.program_id(1)
        row_ids = block * row_tile + jax.lax.broadcasted_iota(
            jnp.int32, (row_tile, 1), 0)
        mask = mask & (row_ids < valid_rows)

    def fold(x):
        # (row_tile, lanes) -> (8, lanes): sublane-aligned VPU adds only; the
        # expensive cross-lane reduce is deferred to outside the kernel.
        r, l = x.shape
        if r % _SUBLANES == 0:
            return jnp.sum(x.reshape(r // _SUBLANES, _SUBLANES, l), axis=0)
        return jnp.sum(x, axis=0, keepdims=True)  # tiny full-array blocks only

    partials = [fold(mask.astype(jnp.float32))]
    err_partials = []
    thresh = 0.05 * jnp.abs(gt) if compute_d1 else None
    for p_ref in pred_refs:
        pred = p_ref[...].astype(jnp.float32)
        d = pred - gt
        ad = jnp.abs(d)
        # F.smooth_l1_loss with default beta=1.0
        sl1 = jnp.where(ad < 1.0, 0.5 * d * d, ad - 0.5)
        partials.append(fold(jnp.where(mask, sl1, 0.0)))
        if compute_d1:
            err = (mask & (ad > 3.0) & (ad > thresh)).astype(jnp.float32)
            err_partials.append(fold(err))
    partials += err_partials

    # Per-index accumulation: no stacked temporary, minimal vst pressure.
    for k, part in enumerate(partials):
        out_ref[0, k, 0:part.shape[0], :] += part


def _masked_sums(preds, gt, maxdisp, compute_d1):
    """One fused kernel pass over all `preds` against `gt`.

    Returns a f32 vector laid out as:
      [count, sl1_sum_0, ..., sl1_sum_{P-1}, (err_sum_0, ..., err_sum_{P-1})]
    """
    if gt.ndim == 4:
        gt = jnp.squeeze(gt, axis=1)              # (B,1,H,W) -> (B,H,W)
    num_preds = len(preds)
    n = gt.size
    for p in preds:
        assert p.size == n, "prediction / gt element counts must match"

    lanes = _choose_lane_width(gt)
    rows = n // lanes
    # Pure reshapes of contiguous arrays: no extra HBM traffic.
    gt2d = gt.reshape(rows, lanes)
    preds2d = [p.reshape(rows, lanes) for p in preds]

    n_splits = _num_tc_splits()
    row_tile, steps = _plan_rows(rows, lanes, num_preds + 1, n_splits)
    real_blocks = _cdiv(rows, row_tile)
    mask_rows = (n_splits * steps * row_tile) != rows

    if n_splits * steps > real_blocks:
        last = real_blocks - 1

        def in_map(c, i):
            # Fully-OOB trailing blocks are clamped to the last real block;
            # the in-kernel row mask zeroes their contribution.
            return (jnp.minimum(c * steps + i, last), 0)
    else:
        def in_map(c, i):
            return (c * steps + i, 0)

    n_out = 1 + (2 if compute_d1 else 1) * num_preds
    kernel = functools.partial(
        _kd_sums_kernel, maxdisp=float(maxdisp), num_preds=num_preds,
        valid_rows=rows, compute_d1=compute_d1, mask_rows=mask_rows)

    bytes_in = sum(int(a.size) * a.dtype.itemsize for a in [gt2d] + preds2d)
    bytes_out = n_splits * n_out * _SUBLANES * lanes * 4
    cost = pl.CostEstimate(
        flops=int(n) * (6 + (14 if compute_d1 else 9) * num_preds),
        transcendentals=0,
        bytes_accessed=int(bytes_in + bytes_out))

    out = pl.pallas_call(
        kernel,
        out_shape=jax.ShapeDtypeStruct(
            (n_splits, n_out, _SUBLANES, lanes), jnp.float32),
        grid_spec=pltpu.PrefetchScalarGridSpec(
            num_scalar_prefetch=0,
            grid=(n_splits, steps),
            in_specs=[pl.BlockSpec((row_tile, lanes), in_map)
                      for _ in range(num_preds + 1)],
            out_specs=pl.BlockSpec((1, n_out, _SUBLANES, lanes),
                                   lambda c, i: (c, 0, 0, 0)),
        ),
        compiler_params=pltpu.CompilerParams(
            # TODO(synk): if plain "parallel" does not shard the leading axis
            # across v7x's two TensorCores, switch it to pltpu.CORE_PARALLEL.
            dimension_semantics=("parallel", "arbitrary"),
            vmem_limit_bytes=_VMEM_LIMIT,
        ),
        cost_estimate=cost,
    )(gt2d, *preds2d)

    # Tiny final cross-lane reduction, done once outside the kernel.
    return jnp.sum(out, axis=(0, 2, 3))


def loss_disp(preds, gt, maxdisp=MAXDISP):
    """KD_warper.loss_disp (masked-mean smooth-L1; weighted sum over a list)."""
    if isinstance(preds, (list, tuple)):
        preds = list(preds)
        weights = [0.5, 0.5, 0.7, 1.0]     # hard-coded, zip-truncated like PyTorch
        if preds and all(p.shape == preds[0].shape for p in preds):
            # Fused: one kernel pass, gt read from HBM exactly once; D1 skipped.
            s = _masked_sums(preds, gt, maxdisp, compute_d1=False)
            inv_cnt = 1.0 / s[0]
            return sum(w * s[1 + i] * inv_cnt
                       for w, i in zip(weights, range(len(preds))))
        # Shapes differ: fall back to one pass per prediction.
        return sum(w * loss_disp(p, gt, maxdisp)
                   for w, p in zip(weights, preds))
    s = _masked_sums([preds], gt, maxdisp, compute_d1=False)
    return s[1] / s[0]


def d1_metric(pred, gt, maxdisp=MAXDISP):
    """KD_warper.D1_metric (masked D1 error rate)."""
    s = _masked_sums([pred], gt, maxdisp, compute_d1=True)
    return s[2] / s[0]


def kd_warper_forward(s_output0, gt, maxdisp=MAXDISP, training=True):
    """Mirrors KD_warper.forward given the student output S_output[0].

    Returns (loss_disp, 0, loss_kd) exactly like the PyTorch module.
    """
    # TODO(synk): Smodel / T_model are external networks (their forward is not
    # part of this module) and are not translated; s_output0 stands in for
    # S_output[0].  Knowledge_distill returns 0 unconditionally, so loss_kd = 0.
    loss_kd = 0
    if training:
        ld = loss_disp(s_output0, gt, maxdisp)
    else:
        # Single fused pass yields BOTH eval metrics (one kernel launch).
        s = _masked_sums([s_output0], gt, maxdisp, compute_d1=True)
        ld = [s[1] / s[0], s[2] / s[0]]
    return (ld, 0, loss_kd)


def _reference(pred, gt, maxdisp=MAXDISP):
    """Pure-JAX reference for sanity checking."""
    gt_s = jnp.squeeze(gt, axis=1)
    mask = (gt_s > 0) & (gt_s < maxdisp)
    maskf = mask.astype(jnp.float32)
    cnt = jnp.sum(maskf)
    d = pred - gt_s
    ad = jnp.abs(d)
    sl1 = jnp.where(ad < 1.0, 0.5 * d * d, ad - 0.5)
    loss = jnp.sum(jnp.where(mask, sl1, 0.0)) / cnt
    err = (ad > 3.0) & (ad > 0.05 * jnp.abs(gt_s))
    d1 = jnp.sum(jnp.where(err & mask, 1.0, 0.0)) / cnt
    return loss, d1


if __name__ == "__main__":
    # Small, deterministic example shapes: B=2, H=16, W=16 disparity maps.
    key = jax.random.PRNGKey(0)
    k1, k2, k3 = jax.random.split(key, 3)
    B, H, W = 2, 16, 16

    # Ground-truth disparity in [0, 240): some pixels fall outside (0, maxdisp)
    # so the mask is non-trivial.
    gt = jax.random.uniform(k1, (B, 1, H, W), dtype=jnp.float32,
                            minval=0.0, maxval=240.0)
    # Student prediction = gt + noise (stands in for S_output[0]).
    pred = jnp.squeeze(gt, axis=1) + 4.0 * jax.random.normal(
        k2, (B, H, W), dtype=jnp.float32)

    # Eval-mode forward: one kernel pass produces both loss_disp and D1.
    (ld, d1), zero, loss_kd = kd_warper_forward(pred, gt, training=False)
    ld = jax.block_until_ready(ld)
    d1 = jax.block_until_ready(d1)

    # Training-mode forward (no D1 branch) and fused list-of-preds path
    # (5 separate kernel inputs, single pass over gt).
    ld_train, _, _ = kd_warper_forward(pred, gt, training=True)
    preds_list = [pred, 0.5 * pred + 1.0, pred - 2.0, 1.1 * pred]
    ld_list = loss_disp(preds_list, gt)
    jax.block_until_ready(ld_train)
    jax.block_until_ready(ld_list)

    # Sanity checks against the pure-JAX reference.
    ref_loss, ref_d1 = _reference(pred, gt)
    weights = [0.5, 0.5, 0.7, 1.0]
    ref_list = sum(w * _reference(p, gt)[0] for w, p in zip(weights, preds_list))

    assert jnp.allclose(ld, ref_loss, rtol=1e-4, atol=1e-5), (ld, ref_loss)
    assert jnp.allclose(d1, ref_d1, rtol=1e-4, atol=1e-5), (d1, ref_d1)
    assert jnp.allclose(ld_train, ref_loss, rtol=1e-4, atol=1e-5)
    assert jnp.allclose(ld_list, ref_list, rtol=1e-4, atol=1e-5), (ld_list, ref_list)

    # Odd, non-128-multiple spatial shape exercises the natural-width path and
    # the in-kernel ragged-row masking (no wrapper padding anywhere).
    gt2 = jax.random.uniform(k3, (1, 1, 13, 27), dtype=jnp.float32,
                             minval=0.0, maxval=240.0)
    pred2 = jnp.squeeze(gt2, axis=1) * 1.05 + 0.3
    (l2, e2), _, _ = kd_warper_forward(pred2, gt2, training=False)
    l2 = jax.block_until_ready(l2)
    e2 = jax.block_until_ready(e2)
    ref_l2, ref_e2 = _reference(pred2, gt2)
    assert jnp.allclose(l2, ref_l2, rtol=1e-4, atol=1e-5), (l2, ref_l2)
    assert jnp.allclose(e2, ref_e2, rtol=1e-4, atol=1e-5), (e2, ref_e2)

    # Direct D1 metric path.
    d1_direct = jax.block_until_ready(d1_metric(pred, gt))
    assert jnp.allclose(d1_direct, ref_d1, rtol=1e-4, atol=1e-5)

    print("KERNEL_OK")
</pallas_src>

<mosaic_0001>
module attributes {stable_mosaic.version = 11 : i64} {
  func.func @_kd_sums_kernel(%arg0: i32, %arg1: i32, %arg2: memref<1x512xf32, #tpu.memory_space<vmem>>, %arg3: memref<1x512xf32, #tpu.memory_space<vmem>>, %arg4: memref<1x3x8x512xf32, #tpu.memory_space<vmem>>) attributes {dimension_semantics = [#tpu.dimension_semantics<parallel>, #tpu.dimension_semantics<arbitrary>], iteration_bounds = array<i64: 1, 1>, scalar_prefetch = 0 : i64, scratch_operands = 0 : i64, tpu.core_type = #tpu.core_type<tc>, window_params = [{transform_indices = @transform_0, window_bounds = array<i64: 1, 512>}, {transform_indices = @transform_1, window_bounds = array<i64: 1, 512>}, {transform_indices = @transform_2, window_bounds = array<i64: 1, 3, 8, 512>}]} {
    %c0_i32 = arith.constant 0 : i32
    %0 = arith.cmpi eq, %arg1, %c0_i32 : i32
    %1 = arith.extui %0 : i1 to i32
    %c0_i32_0 = arith.constant 0 : i32
    %2 = arith.cmpi ne, %1, %c0_i32_0 : i32
    scf.if %2 {
      %cst_36 = arith.constant 0.000000e+00 : f32
      %58 = vector.broadcast %cst_36 : f32 to vector<1x3x8x512xf32>
      %c0_37 = arith.constant 0 : index
      %c0_38 = arith.constant 0 : index
      %c0_39 = arith.constant 0 : index
      %c0_40 = arith.constant 0 : index
      %59 = vector.load %arg4[%c0_37, %c0_38, %c0_39, %c0_40] : memref<1x3x8x512xf32, #tpu.memory_space<vmem>>, vector<1x3x8x512xf32>
      tpu.vector_store %arg4[%c0_37, %c0_38, %c0_39, %c0_40], %58 {strides = array<i32>} : memref<1x3x8x512xf32, #tpu.memory_space<vmem>>, vector<1x3x8x512xf32>,
    } else {
    }
    %c0 = arith.constant 0 : index
    %c0_1 = arith.constant 0 : index
    %3 = vector.load %arg2[%c0, %c0_1] : memref<1x512xf32, #tpu.memory_space<vmem>>, vector<1x512xf32>
    %cst = arith.constant 0.000000e+00 : f32
    %4 = vector.broadcast %cst : f32 to vector<1x512xf32>
    %5 = arith.cmpf ogt, %3, %4 : vector<1x512xf32>
    %cst_2 = arith.constant 1.920000e+02 : f32
    %6 = vector.broadcast %cst_2 : f32 to vector<1x512xf32>
    %7 = arith.cmpf olt, %3, %6 : vector<1x512xf32>
    %8 = arith.andi %5, %7 : vector<1x512xi1>
    %9 = arith.extui %8 : vector<1x512xi1> to vector<1x512xi32>
    %10 = arith.sitofp %9 : vector<1x512xi32> to vector<1x512xf32>
    %cst_3 = arith.constant dense<0.000000e+00> : vector<512xf32>
    %11 = vector.multi_reduction <add>, %10, %cst_3 [0] : vector<1x512xf32> to vector<512xf32>
    %12 = vector.shape_cast %11 : vector<512xf32> to vector<1x512xf32>
    %13 = math.absf %3 : vector<1x512xf32>
    %cst_4 = arith.constant 5.000000e-02 : f32
    %14 = vector.broadcast %cst_4 : f32 to vector<1x512xf32>
    %15 = arith.mulf %14, %13 : vector<1x512xf32>
    %c0_5 = arith.constant 0 : index
    %c0_6 = arith.constant 0 : index
    %16 = vector.load %arg3[%c0_5, %c0_6] : memref<1x512xf32, #tpu.memory_space<vmem>>, vector<1x512xf32>
    %17 = arith.subf %16, %3 : vector<1x512xf32>
    %18 = math.absf %17 : vector<1x512xf32>
    %cst_7 = arith.constant 1.000000e+00 : f32
    %19 = vector.broadcast %cst_7 : f32 to vector<1x512xf32>
    %20 = arith.cmpf olt, %18, %19 : vector<1x512xf32>
    %cst_8 = arith.constant 5.000000e-01 : f32
    %21 = vector.broadcast %cst_8 : f32 to vector<1x512xf32>
    %22 = arith.mulf %21, %17 : vector<1x512xf32>
    %23 = arith.mulf %22, %17 : vector<1x512xf32>
    %cst_9 = arith.constant 5.000000e-01 : f32
    %24 = vector.broadcast %cst_9 : f32 to vector<1x512xf32>
    %25 = arith.subf %18, %24 : vector<1x512xf32>
    %26 = arith.select %20, %23, %25 : vector<1x512xi1>, vector<1x512xf32>
    %cst_10 = arith.constant 0.000000e+00 : f32
    %27 = vector.broadcast %cst_10 : f32 to vector<1x512xf32>
    %28 = arith.select %8, %26, %27 : vector<1x512xi1>, vector<1x512xf32>
    %cst_11 = arith.constant dense<0.000000e+00> : vector<512xf32>
    %29 = vector.multi_reduction <add>, %28, %cst_11 [0] : vector<1x512xf32> to vector<512xf32>
    %30 = vector.shape_cast %29 : vector<512xf32> to vector<1x512xf32>
    %cst_12 = arith.constant 3.000000e+00 : f32
    %31 = vector.broadcast %cst_12 : f32 to vector<1x512xf32>
    %32 = arith.cmpf ogt, %18, %31 : vector<1x512xf32>
    %33 = arith.andi %8, %32 : vector<1x512xi1>
    %34 = arith.cmpf ogt, %18, %15 : vector<1x512xf32>
    %35 = arith.andi %33, %34 : vector<1x512xi1>
    %36 = arith.extui %35 : vector<1x512xi1> to vector<1x512xi32>
    %37 = arith.sitofp %36 : vector<1x512xi32> to vector<1x512xf32>
    %cst_13 = arith.constant dense<0.000000e+00> : vector<512xf32>
    %38 = vector.multi_reduction <add>, %37, %cst_13 [0] : vector<1x512xf32> to vector<512xf32>
    %39 = vector.shape_cast %38 : vector<512xf32> to vector<1x512xf32>
    %c0_14 = arith.constant 0 : index
    %c0_15 = arith.constant 0 : index
    %c0_16 = arith.constant 0 : index
    %c0_17 = arith.constant 0 : index
    %40 = vector.load %arg4[%c0_14, %c0_15, %c0_16, %c0_17] : memref<1x3x8x512xf32, #tpu.memory_space<vmem>>, vector<1x1x1x512xf32>
    %41 = vector.shape_cast %40 : vector<1x1x1x512xf32> to vector<1x512xf32>
    %42 = arith.addf %41, %12 : vector<1x512xf32>
    %c0_18 = arith.constant 0 : index
    %c0_19 = arith.constant 0 : index
    %c0_20 = arith.constant 0 : index
    %c0_21 = arith.constant 0 : index
    %43 = vector.load %arg4[%c0_18, %c0_19, %c0_20, %c0_21] : memref<1x3x8x512xf32, #tpu.memory_space<vmem>>, vector<1x1x1x512xf32>
    %44 = vector.shape_cast %43 : vector<1x1x1x512xf32> to vector<1x512xf32>
    %45 = vector.shape_cast %42 : vector<1x512xf32> to vector<1x1x1x512xf32>
    tpu.vector_store %arg4[%c0_18, %c0_19, %c0_20, %c0_21], %45 {strides = array<i32>} : memref<1x3x8x512xf32, #tpu.memory_space<vmem>>, vector<1x1x1x512xf32>,
    %c0_22 = arith.constant 0 : index
    %c1 = arith.constant 1 : index
    %c0_23 = arith.constant 0 : index
    %c0_24 = arith.constant 0 : index
    %46 = vector.load %arg4[%c0_22, %c1, %c0_23, %c0_24] : memref<1x3x8x512xf32, #tpu.memory_space<vmem>>, vector<1x1x1x512xf32>
    %47 = vector.shape_cast %46 : vector<1x1x1x512xf32> to vector<1x512xf32>
    %48 = arith.addf %47, %30 : vector<1x512xf32>
    %c0_25 = arith.constant 0 : index
    %c1_26 = arith.constant 1 : index
    %c0_27 = arith.constant 0 : index
    %c0_28 = arith.constant 0 : index
    %49 = vector.load %arg4[%c0_25, %c1_26, %c0_27, %c0_28] : memref<1x3x8x512xf32, #tpu.memory_space<vmem>>, vector<1x1x1x512xf32>
    %50 = vector.shape_cast %49 : vector<1x1x1x512xf32> to vector<1x512xf32>
    %51 = vector.shape_cast %48 : vector<1x512xf32> to vector<1x1x1x512xf32>
    tpu.vector_store %arg4[%c0_25, %c1_26, %c0_27, %c0_28], %51 {strides = array<i32>} : memref<1x3x8x512xf32, #tpu.memory_space<vmem>>, vector<1x1x1x512xf32>,
    %c0_29 = arith.constant 0 : index
    %c2 = arith.constant 2 : index
    %c0_30 = arith.constant 0 : index
    %c0_31 = arith.constant 0 : index
    %52 = vector.load %arg4[%c0_29, %c2, %c0_30, %c0_31] : memref<1x3x8x512xf32, #tpu.memory_space<vmem>>, vector<1x1x1x512xf32>
    %53 = vector.shape_cast %52 : vector<1x1x1x512xf32> to vector<1x512xf32>
    %54 = arith.addf %53, %39 : vector<1x512xf32>
    %c0_32 = arith.constant 0 : index
    %c2_33 = arith.constant 2 : index
    %c0_34 = arith.constant 0 : index
    %c0_35 = arith.constant 0 : index
    %55 = vector.load %arg4[%c0_32, %c2_33, %c0_34, %c0_35] : memref<1x3x8x512xf32, #tpu.memory_space<vmem>>, vector<1x1x1x512xf32>
    %56 = vector.shape_cast %55 : vector<1x1x1x512xf32> to vector<1x512xf32>
    %57 = vector.shape_cast %54 : vector<1x512xf32> to vector<1x1x1x512xf32>
    tpu.vector_store %arg4[%c0_32, %c2_33, %c0_34, %c0_35], %57 {strides = array<i32>} : memref<1x3x8x512xf32, #tpu.memory_space<vmem>>, vector<1x1x1x512xf32>,
    return
  }
  func.func @transform_0(%arg0: i32, %arg1: i32) -> (i32, i32) {
    %c1_i32 = arith.constant 1 : i32
    %0 = arith.muli %arg0, %c1_i32 : i32
    %1 = arith.addi %0, %arg1 : i32
    %c0_i32 = arith.constant 0 : i32
    %c0_i32_0 = arith.constant 0 : i32
    return %1, %c0_i32 : i32, i32
  }
  func.func @transform_1(%arg0: i32, %arg1: i32) -> (i32, i32) {
    %c1_i32 = arith.constant 1 : i32
    %0 = arith.muli %arg0, %c1_i32 : i32
    %1 = arith.addi %0, %arg1 : i32
    %c0_i32 = arith.constant 0 : i32
    %c0_i32_0 = arith.constant 0 : i32
    return %1, %c0_i32 : i32, i32
  }
  func.func @transform_2(%arg0: i32, %arg1: i32) -> (i32, i32, i32, i32) {
    %c0_i32 = arith.constant 0 : i32
    %c0_i32_0 = arith.constant 0 : i32
    %c0_i32_1 = arith.constant 0 : i32
    %c0_i32_2 = arith.constant 0 : i32
    return %arg0, %c0_i32, %c0_i32_0, %c0_i32_1 : i32, i32, i32, i32
  }
}

</mosaic_0001>

<bundles_post_ra>
// kernel: tpu_custom_call.1
= control target key start
LH: loop header
LB: loop body
LE: loop exit
PB: predicated region body
PF: predicated region fallthrough
CT: control target
= control target key end

     0   :  { %7 = vsyncpa [#allocation3], 0  ;;  %s249_s0 = inlined_call_operand.hbm [shape: f32[1,512], index: 0, kind: input, shape index: {}]   ;;  %s250_s1 = inlined_call_operand.hbm [shape: f32[1,512], index: 1, kind: input, shape index: {}]   ;;  %s251_s2 = inlined_call_operand.hbm [shape: f32[1,3,8,512], index: 2, kind: output, shape index: {}]  }
   0x1   :  { %8 = vsyncpa [#allocation6], 0 }
   0x2   :  { %9 = vsyncpa [#allocation4], 0  ;;  %s199_s9 = smov [#allocation2]   ;;  %s200_s11 = smov [#allocation5]  }
   0x3   :  { %s20_s10 = sshll.u32 %s199_s9, 4  ;;  %s34_s12 = sshll.u32 %s200_s11, 4  ;;  %s21_s10 = int_to_ptr.vmem [resolvable:$true] %s20_s10  ;;  %s35_s12 = int_to_ptr.vmem [resolvable:$true] %s34_s12 }
   0x4   :  { %s141_s13 = scalar_lea.vmem %s21_s10, 64  ;;  %p146_p1 = scmp.lt.s32.totalorder %s21_s10, %s21_s10 }
   0x5   :  { %p142_p0 = scmp.ne.s32.totalorder %s21_s10, %s141_s13  ;;  %p147_p2 = scmp.lt.s32.totalorder %s141_s13, %s141_s13 }
   0x7   :  { %p148_p3 = por %p147_p2, %p146_p1 }
   0x9   :  { %p149_p4 = pnand %p148_p3, %p142_p0 }
   0xb   :  { %152 = shalt.err (!%p149_p4)
}
   0xc   :  { %23 = dma.hbm_to_vmem [thread:$0]  %s249_s0, 64, %s21_s10, [#allocation3]  }
   0xd   :  { %s161_s16 = scalar_lea.vmem %s35_s12, 64  ;;  %p166_p6 = scmp.lt.s32.totalorder %s35_s12, %s35_s12 }
   0xe   :  { %p162_p5 = scmp.ne.s32.totalorder %s35_s12, %s161_s16  ;;  %p167_p7 = scmp.lt.s32.totalorder %s161_s16, %s161_s16 }
  0x10   :  { %p168_p8 = por %p167_p7, %p166_p6 }
  0x12   :  { %p169_p9 = pnand %p168_p8, %p162_p5 }
  0x14   :  { %172 = shalt.err (!%p169_p9)
}
  0x15   :  { %37 = dma.hbm_to_vmem [thread:$0]  %s250_s1, 64, %s35_s12, [#allocation6]  }
  0x16   :  { %193 = dma.done.wait [#allocation3], 64  }
  0x17   :  { %194 = vsyncadd [#allocation3], 4294967232 }
  0x18   :  { %195 = dma.done.wait [#allocation6], 64  }
  0x19   :  { %196 = vsyncadd [#allocation6], 4294967232  ;;  %v201_v0 = vmov 0.0   ;;  %v90_v1 = vlaneseq  ;;  %v62_v2 = vld [vmem:[#allocation2] sm:$0xf]  ;;  %s202_s0 = smov [#allocation7]  }
  0x1a   :  { %50 = vst [vmem:[#allocation7] sm:$0xff] %v201_v0  ;;  %51 = vst [vmem:[#allocation7 + $0x8] sm:$0xff] %v201_v0  ;;  %v71_v3 = vld [vmem:[#allocation5] sm:$0xf]  ;;  %vm63_vm0 = vcmp.gt.f32.partialorder %v62_v2, 0.0  ;;  %vm64_vm1 = vcmp.lt.f32.partialorder %v62_v2, 192.0 }
  0x1b   :  { %52 = vst [vmem:[#allocation7 + $0x10] sm:$0xff] %v201_v0  ;;  %53 = vst [vmem:[#allocation7 + $0x18] sm:$0xff] %v201_v0  ;;  %v72_v5 = vsub.f32 %v71_v3, %v62_v2  ;;  %v69_v7 = vand.u32 2147483647, %v62_v2  ;;  %vm232_vm3 = vcmp.lt.s32.totalorder %v90_v1, 512  ;;  %s111_s1 = sshll.u32 %s202_s0, 4  ;;  %s112_s1 = int_to_ptr.vmem [resolvable:$true] %s111_s1 }
  0x1c   :  { %54 = vst [vmem:[#allocation7 + $0x20] sm:$0xff] %v201_v0  ;;  %55 = vst [vmem:[#allocation7 + $0x28] sm:$0xff] %v201_v0  ;;  %s173_s19 = scalar_lea.vmem %s112_s1, 1536  ;;  %p178_p11 = scmp.lt.s32.totalorder %s112_s1, %s112_s1 }
  0x1d   :  { %56 = vst [vmem:[#allocation7 + $0x30] sm:$0xff] %v201_v0  ;;  %57 = vst [vmem:[#allocation7 + $0x38] sm:$0xff] %v201_v0  ;;  %v73_v10 = vand.u32 2147483647, %v72_v5  ;;  %v75_v11 = vmul.f32 0.5, %v72_v5  ;;  %p174_p10 = scmp.ne.s32.totalorder %s112_s1, %s173_s19  ;;  %p179_p12 = scmp.lt.s32.totalorder %s173_s19, %s173_s19 }
  0x1e   :  { %58 = vst [vmem:[#allocation7 + $0x40] sm:$0xff] %v201_v0  ;;  %59 = vst [vmem:[#allocation7 + $0x48] sm:$0xff] %v201_v0  ;;  %v70_v13 = vmul.f32 0.05, %v69_v7 }
  0x1f   :  { %60 = vst [vmem:[#allocation7 + $0x50] sm:$0xff] %v201_v0  ;;  %61 = vst [vmem:[#allocation7 + $0x58] sm:$0xff] %v201_v0  ;;  %vm74_vm4 = vcmp.lt.f32.partialorder %v73_v10, 1.0  ;;  %v76_v14 = vmul.f32 %v75_v11, %v72_v5  ;;  %v125_v15 = vadd.f32 -0.5, %v73_v10  ;;  %vm81_vm5 = vcmp.gt.f32.partialorder %v73_v10, 3.0  ;;  %p180_p13 = por %p179_p12, %p178_p11 }
  0x20   :  { %vm226_vm2 = vmand %vm63_vm0, %vm64_vm1  ;;  %vm83_vm7 = vcmp.gt.f32.partialorder %v73_v10, %v70_v13 }
  0x21   :  { %v124_v8 = vsel %vm226_vm2, 1.0, %v201_v0  ;;  %vm82_vm6 = vmand %vm226_vm2, %vm81_vm5  ;;  %v78_v18 = vsel %vm74_vm4, %v76_v14, %v125_v15  ;;  %p181_p0 = pnand %p180_p13, %p174_p10 }
  0x22   :  { %v88_v4 = vld [vmem:[#allocation7] ss:$8 sm:$0xf]  ;;  %vm84_vm8 = vmand %vm82_vm6, %vm83_vm7  ;;  %v79_v19 = vsel %vm226_vm2, %v78_v18, 0.0 }
  0x23   :  { %v89_v12 = vadd.f32 %v124_v8, %v88_v4  ;;  %v126_v20 = vsel %vm84_vm8, 1.0, %v201_v0 }
  0x24   :  { %v97_v16 = vld [vmem:[#allocation7 + $0x20] ss:$8 sm:$0xf] }
  0x25   :  { %94 = vst.msk [vmem:[#allocation7] ss:$8 sm:$0xf] %vm232_vm3, %v89_v12  ;;  %v98_v21 = vadd.f32 %v97_v16, %v79_v19 }
  0x26   :  { %v102_v17 = vld [vmem:[#allocation7 + $0x40] ss:$8 sm:$0xf] }
  0x27   :  { %v103_v22 = vadd.f32 %v126_v20, %v102_v17  ;;  %99 = vst.msk [vmem:[#allocation7 + $0x20] ss:$8 sm:$0xf] %vm232_vm3, %v98_v21 }
  0x29   :  { %104 = vst.msk [vmem:[#allocation7 + $0x40] ss:$8 sm:$0xf] %vm232_vm3, %v103_v22 }
  0x2a   :  { %184 = shalt.err (!%p181_p0)
}
  0x2b   :  { %s203_s20 = smov 512   ;;  %s204_s21 = smov 32  }
  0x2c   :  { %117 = dma.vmem_to_hbm [thread:$0]  %s112_s1, 1536, %s251_s2, [#allocation4], %s203_s20, %s203_s20, %s204_s21  }
  0x2d   :  { %197 = dma.done.wait [#allocation4], 1536  }
  0x2e   :  { %198 = vsyncadd [#allocation4], 4294965760 }
  0x2f   :  { %121 = vsyncpa [#allocation3], 1 }
  0x30   :  { %122 = vsyncpa [#allocation6], 1 }
  0x31   :  { %123 = vsyncpa [#allocation4], 1 }

</bundles_post_ra>
